<compile_context>
chip_gen: v6e
topology: v6e:2x2x1
jax: 0.10.0
libtpu: 0.0.40
codegen_flags: <defaults>
</compile_context>

<pallas_src>
import jax
import jax.numpy as jnp
from jax.experimental import pallas as pl
from jax.experimental.pallas import tpu as pltpu


_LANE = 128        # TPU lane width; batch-tile must be a multiple of this
_TB_MAX = 32768    # max batch tile (lanes); ~4 MiB double-buffered in/out tiles
_SMALL_B = 1024    # below this, single whole-array block, no grid / pipelining


def _round_up(a, m):
    return ((a + m - 1) // m) * m


def linear_sub_relu_kernel(x_ref, w_ref, b_ref, o_ref):
    """o = relu(W @ x + b_fused) in feature-major (lane-dense) layout.

    x_ref: (IN, TB)   batch on the 128-lane axis
    w_ref: (OUT, IN)  native nn.Linear layout
    b_ref: (OUT, 1)   bias with the constant -3 already folded in
    o_ref: (OUT, TB)  batch on lanes -> unmasked, contiguous store
    """
    x = x_ref[...]
    w = w_ref[...]
    b = b_ref[...]
    in_features = x.shape[0]  # static (5) -> fully unrolled VPU MAC chain
    # (OUT,1)*(1,TB) -> (OUT,TB); bias folded into the first MAC.
    acc = w[:, 0:1] * x[0:1, :] + b
    for k in range(1, in_features):
        acc = acc + w[:, k:k + 1] * x[k:k + 1, :]
    o_ref[...] = jnp.maximum(acc, 0.0).astype(o_ref.dtype)


def prepare_params(weight, bias):
    """One-time parameter prep (call at init, NOT per forward call)."""
    w = jnp.asarray(weight, jnp.float32)                             # (OUT, IN)
    b_fused = (jnp.asarray(bias, jnp.float32) - 3.0).reshape(-1, 1)  # (OUT, 1)
    return w, b_fused


def model_forward(x, w, b_fused):
    """x: (B, IN) f32, w: (OUT, IN) f32, b_fused: (OUT, 1) f32 -> (B, OUT)."""
    B, IN = x.shape
    OUT = w.shape[0]

    # Layout plumbing (outside the kernel): batch goes onto the lane axis.
    x_t = x.T  # (IN, B)

    if B <= _SMALL_B:
        # Tiny batch (the spec's (1, 5) case): single whole-array block,
        # no grid, no pipelining prologue.
        y_t = pl.pallas_call(
            linear_sub_relu_kernel,
            out_shape=jax.ShapeDtypeStruct((OUT, B), jnp.float32),
        )(x_t, w, b_fused)
        return y_t.T

    # Large batch: stream x_t / y_t through VMEM in lane-dense (.., tb) tiles.
    # Keep tb <= _TB_MAX but also ensure >=2 grid steps so v7x's two
    # TensorCores both get work under dimension_semantics=("parallel",).
    tb = min(_TB_MAX, _round_up(-(-B // 2), _LANE))
    grid = (pl.cdiv(B, tb),)
    y_t = pl.pallas_call(
        linear_sub_relu_kernel,
        out_shape=jax.ShapeDtypeStruct((OUT, B), jnp.float32),
        grid=grid,
        in_specs=[
            pl.BlockSpec((IN, tb), lambda i: (0, i)),   # x_t: batch on lanes
            pl.BlockSpec((OUT, IN), lambda i: (0, 0)),  # weight: resident
            pl.BlockSpec((OUT, 1), lambda i: (0, 0)),   # fused bias: resident
        ],
        out_specs=pl.BlockSpec((OUT, tb), lambda i: (0, i)),  # lane-dense out
        compiler_params=pltpu.CompilerParams(dimension_semantics=("parallel",)),
    )(x_t, w, b_fused)
    return y_t.T


if __name__ == "__main__":
    key = jax.random.PRNGKey(0)
    kx, kw, kb, kx2 = jax.random.split(key, 4)

    B, IN, OUT = 1, 5, 8
    # Deterministic init mimicking nn.Linear's uniform(-1/sqrt(IN), 1/sqrt(IN)).
    bound = 1.0 / jnp.sqrt(jnp.float32(IN))
    weight = jax.random.uniform(kw, (OUT, IN), jnp.float32, -bound, bound)
    bias = jax.random.uniform(kb, (OUT,), jnp.float32, -bound, bound)

    # One-time parameter prep (fold the -3 into the bias).
    w, b_fused = prepare_params(weight, bias)

    # --- spec-sized input (1, 5): single-block, no-grid path ---
    x3 = jax.random.normal(kx, (B, IN), jnp.float32)
    out = jax.block_until_ready(model_forward(x3, w, b_fused))
    ref = jnp.maximum(x3 @ weight.T + bias - 3.0, 0.0)
    assert out.shape == (B, OUT)
    assert jnp.allclose(out, ref, atol=1e-5), "mismatch vs reference (small batch)"

    # --- large-batch sanity check: tiled lane-dense path, B NOT a multiple of
    #     the tile or lane width -> exercises Pallas tail masking ---
    B_big = 5000
    x_big = jax.random.normal(kx2, (B_big, IN), jnp.float32)
    out_big = jax.block_until_ready(model_forward(x_big, w, b_fused))
    ref_big = jnp.maximum(x_big @ weight.T + bias - 3.0, 0.0)
    assert out_big.shape == (B_big, OUT)
    assert jnp.allclose(out_big, ref_big, atol=1e-5), "mismatch vs reference (large batch)"

    print("KERNEL_OK")
</pallas_src>

<mosaic_0001>
module attributes {stable_mosaic.version = 11 : i64} {
  func.func @linear_sub_relu_kernel(%arg0: memref<5x1xf32, #tpu.memory_space<vmem>>, %arg1: memref<8x5xf32, #tpu.memory_space<vmem>>, %arg2: memref<8x1xf32, #tpu.memory_space<vmem>>, %arg3: memref<8x1xf32, #tpu.memory_space<vmem>>) attributes {dimension_semantics = [], scalar_prefetch = 0 : i64, scratch_operands = 0 : i64, tpu.core_type = #tpu.core_type<tc>} {
    %c0 = arith.constant 0 : index
    %c0_0 = arith.constant 0 : index
    %0 = vector.load %arg0[%c0, %c0_0] : memref<5x1xf32, #tpu.memory_space<vmem>>, vector<5x1xf32>
    %c0_1 = arith.constant 0 : index
    %c0_2 = arith.constant 0 : index
    %1 = vector.load %arg1[%c0_1, %c0_2] : memref<8x5xf32, #tpu.memory_space<vmem>>, vector<8x5xf32>
    %c0_3 = arith.constant 0 : index
    %c0_4 = arith.constant 0 : index
    %2 = vector.load %arg2[%c0_3, %c0_4] : memref<8x1xf32, #tpu.memory_space<vmem>>, vector<8x1xf32>
    %3 = vector.extract_strided_slice %1 {offsets = [0, 0], sizes = [8, 1], strides = [1, 1]} : vector<8x5xf32> to vector<8x1xf32>
    %4 = vector.extract_strided_slice %0 {offsets = [0, 0], sizes = [1, 1], strides = [1, 1]} : vector<5x1xf32> to vector<1x1xf32>
    %5 = vector.broadcast %4 : vector<1x1xf32> to vector<8x1xf32>
    %6 = arith.mulf %3, %5 : vector<8x1xf32>
    %7 = arith.addf %6, %2 : vector<8x1xf32>
    %8 = vector.extract_strided_slice %1 {offsets = [0, 1], sizes = [8, 1], strides = [1, 1]} : vector<8x5xf32> to vector<8x1xf32>
    %9 = vector.extract_strided_slice %0 {offsets = [1, 0], sizes = [1, 1], strides = [1, 1]} : vector<5x1xf32> to vector<1x1xf32>
    %10 = vector.broadcast %9 : vector<1x1xf32> to vector<8x1xf32>
    %11 = arith.mulf %8, %10 : vector<8x1xf32>
    %12 = arith.addf %7, %11 : vector<8x1xf32>
    %13 = vector.extract_strided_slice %1 {offsets = [0, 2], sizes = [8, 1], strides = [1, 1]} : vector<8x5xf32> to vector<8x1xf32>
    %14 = vector.extract_strided_slice %0 {offsets = [2, 0], sizes = [1, 1], strides = [1, 1]} : vector<5x1xf32> to vector<1x1xf32>
    %15 = vector.broadcast %14 : vector<1x1xf32> to vector<8x1xf32>
    %16 = arith.mulf %13, %15 : vector<8x1xf32>
    %17 = arith.addf %12, %16 : vector<8x1xf32>
    %18 = vector.extract_strided_slice %1 {offsets = [0, 3], sizes = [8, 1], strides = [1, 1]} : vector<8x5xf32> to vector<8x1xf32>
    %19 = vector.extract_strided_slice %0 {offsets = [3, 0], sizes = [1, 1], strides = [1, 1]} : vector<5x1xf32> to vector<1x1xf32>
    %20 = vector.broadcast %19 : vector<1x1xf32> to vector<8x1xf32>
    %21 = arith.mulf %18, %20 : vector<8x1xf32>
    %22 = arith.addf %17, %21 : vector<8x1xf32>
    %23 = vector.extract_strided_slice %1 {offsets = [0, 4], sizes = [8, 1], strides = [1, 1]} : vector<8x5xf32> to vector<8x1xf32>
    %24 = vector.extract_strided_slice %0 {offsets = [4, 0], sizes = [1, 1], strides = [1, 1]} : vector<5x1xf32> to vector<1x1xf32>
    %25 = vector.broadcast %24 : vector<1x1xf32> to vector<8x1xf32>
    %26 = arith.mulf %23, %25 : vector<8x1xf32>
    %27 = arith.addf %22, %26 : vector<8x1xf32>
    %cst = arith.constant 0.000000e+00 : f32
    %28 = vector.broadcast %cst : f32 to vector<8x1xf32>
    %29 = arith.maximumf %27, %28 : vector<8x1xf32>
    %c0_5 = arith.constant 0 : index
    %c0_6 = arith.constant 0 : index
    %30 = vector.load %arg3[%c0_5, %c0_6] : memref<8x1xf32, #tpu.memory_space<vmem>>, vector<8x1xf32>
    tpu.vector_store %arg3[%c0_5, %c0_6], %29 {strides = array<i32>} : memref<8x1xf32, #tpu.memory_space<vmem>>, vector<8x1xf32>,
    return
  }
}

</mosaic_0001>

<bundles_post_ra>
// kernel: tpu_custom_call.1
= control target key start
LH: loop header
LB: loop body
LE: loop exit
PB: predicated region body
PF: predicated region fallthrough
CT: control target
= control target key end

     0   :  { %v17_v0 = vlaneseq  ;;  %s94_s14 = smov 1   ;;  %s95_s15 = smov 3   ;;  %vm80_vm0 = vcmask 7168   ;;  %s134_s0 = inlined_call_operand.vmem [shape: f32[5,1], index: 0, kind: input, shape index: {}]   ;;  %s135_s1 = inlined_call_operand.vmem [shape: f32[8,5], index: 1, kind: input, shape index: {}]   ;;  %s136_s2 = inlined_call_operand.vmem [shape: f32[8,1], index: 2, kind: input, shape index: {}]   ;;  %s137_s3 = inlined_call_operand.vmem [shape: f32[8,1], index: 3, kind: output, shape index: {}]  }
   0x1   :  { %v14_v2 = vld [vmem:[%s134_s0] sm:$0x1f]  ;;  %s96_s16 = smov 2   ;;  %s97_s17 = smov 4  }
   0x2   :  { %v18_v1 = vshrl.u32 %v17_v0, 7  ;;  %v15_v13 = vld [vmem:[%s135_s1] sm:$0xff]  ;;  %s98_s19 = smov 127   ;;  %s99_s20 = smov 125  }
   0x3   :  { %s100_s21 = smov 126   ;;  %s101_s22 = smov 124   ;;  %v16_v23 = vld [vmem:[%s136_s2] sm:$0xff] }
   0x4   :  { %v25_v3 = vsub.s32 1, %v18_v1  ;;  %v53_v4 = vsub.s32 3, %v18_v1  ;;  %v39_v5 = vsub.s32 2, %v18_v1  ;;  %v67_v6 = vsub.s32 4, %v18_v1 }
   0x5   :  { %v19_v11 = vsub.s32 0, %v18_v1 }
   0x6   :  { %v26_v7 = vrot.slane %v14_v2, %v25_v3  ;;  %v54_v8 = vrot.slane %v14_v2, %v53_v4  ;;  %v40_v9 = vrot.slane %v14_v2, %v39_v5  ;;  %v68_v10 = vrot.slane %v14_v2, %v67_v6 }
   0x7   :  { %v20_v12 = vrot.slane %v14_v2, %v19_v11 }
   0x8   :  { %28 = vrot.lane.b32.xlu0 %v26_v7, %s94_s14  ;;  %56 = vrot.lane.b32.xlu1 %v54_v8, %s95_s15 }
   0x9   :  { %v21_v14 = vmul.f32 %v20_v12, %v15_v13 }
   0xb   :  { %v22_v24 = vadd.f32 %v21_v14, %v16_v23 }
   0xc   :  { %42 = vrot.lane.b32.xlu0 %v40_v9, %s96_s16  ;;  %70 = vrot.lane.b32.xlu1 %v68_v10, %s97_s17 }
  0x7a   :  { %v29_v15 = vpop.permute.xlu0 %28  ;;  %v57_v16 = vpop.permute.xlu1 %56 }
  0x7b   :  { %v31_v17 = vmul.f32 %v29_v15, %v15_v13  ;;  %v59_v18 = vmul.f32 %v57_v16, %v15_v13 }
  0x7d   :  { %33 = vrot.lane.b32.xlu0 %v31_v17, %s98_s19 }
  0x7e   :  { %v43_v19 = vpop.permute.xlu0 %42  ;;  %v71_v20 = vpop.permute.xlu1 %70 }
  0x7f   :  { %v45_v21 = vmul.f32 %v43_v19, %v15_v13  ;;  %v73_v22 = vmul.f32 %v71_v20, %v15_v13 }
  0x81   :  { %61 = vrot.lane.b32.xlu0 %v59_v18, %s99_s20  ;;  %47 = vrot.lane.b32.xlu1 %v45_v21, %s100_s21 }
  0x85   :  { %75 = vrot.lane.b32.xlu1 %v73_v22, %s101_s22 }
  0xef   :  { %v34_v25 = vpop.permute.xlu0 %33 }
  0xf0   :  { %v36_v26 = vadd.f32 %v34_v25, %v22_v24 }
  0xf3   :  { %v48_v27 = vpop.permute.xlu1 %47  ;;  %v62_v29 = vpop.permute.xlu0 %61 }
  0xf4   :  { %v50_v28 = vadd.f32 %v48_v27, %v36_v26 }
  0xf6   :  { %v64_v30 = vadd.f32 %v62_v29, %v50_v28 }
  0xf7   :  { %v76_v31 = vpop.permute.xlu1 %75 }
  0xf8   :  { %v78_v32 = vadd.f32 %v76_v31, %v64_v30 }
  0xfa   :  { %v79_v33 = vmax.f32 %v78_v32, 0.0 }
  0xfc   :  { %81 = vst.msk [vmem:[%s137_s3] sm:$0xff] %vm80_vm0, %v79_v33 }

</bundles_post_ra>
